<compile_context>
chip_gen: v7x
topology: tpu7x:2x2x1
jax: 0.10.0
libtpu: 0.0.40
codegen_flags: <defaults>
</compile_context>

<pallas_src>
import jax
import jax.numpy as jnp
from jax.experimental import pallas as pl
from jax.experimental.pallas import tpu as pltpu

BN_EPS = 1e-5
COS_EPS = 1e-8


# ------------------------------ fused kernel ------------------------------- #

def gcn3_fused_kernel(scal_ref,                    # SMEM [2]: [prelu_a, sum of proj biases]
                      x_ref, vb_ref, vf_ref,       # [N,2] f32, [N,2048] bf16, [N,512] bf16
                      w1_ref, b1_ref,              # BN-folded Linear(2,32)
                      w2_ref, b2_ref,              # Linear(32,32)
                      wb_ref, bb_ref,              # body convs, stacked [3,32,32], [3,1,32]
                      wf_ref, bf_ref,              # face convs, stacked [3,32,32], [3,1,32]
                      wp_ref,                      # projections stacked [3,32,1] (node, body, face)
                      o_ref):                      # [N,1] f32
    n = x_ref.shape[0]

    def cos_adj(v_ref):
        # Gram matrix first (bf16 inputs, f32 accumulation on the MXU, RHS
        # consumed transposed by the MXU — no materialized transpose).
        v = v_ref[...]
        g = jax.lax.dot_general(v, v, (((1,), (1,)), ((), ())),
                                preferred_element_type=jnp.float32)      # [N,N]
        # Normalize AFTER the Gram matrix: only the diagonal is needed.
        row = jax.lax.broadcasted_iota(jnp.int32, (n, n), 0)
        col = jax.lax.broadcasted_iota(jnp.int32, (n, n), 1)
        gd = jnp.where(row == col, g, 0.0)
        norm_col = jnp.sqrt(jnp.sum(gd, axis=-1, keepdims=True))         # [N,1]
        norm_row = jnp.sqrt(jnp.sum(gd, axis=-2, keepdims=True))         # [1,N]
        inv_col = 1.0 / jnp.maximum(norm_col, COS_EPS)
        inv_row = 1.0 / jnp.maximum(norm_row, COS_EPS)
        return g * inv_col * inv_row

    adj_b = cos_adj(vb_ref)
    adj_f = cos_adj(vf_ref)

    # input_mlp: (BN folded) Linear(2,32) -> PReLU -> Dropout(0) -> Linear(32,32)
    x = x_ref[...]
    h = jnp.dot(x, w1_ref[...], preferred_element_type=jnp.float32) + b1_ref[...]
    a = scal_ref[0]                                                      # PReLU slope
    h = jnp.where(h >= 0.0, h, a * h)
    out = jnp.dot(h, w2_ref[...], preferred_element_type=jnp.float32) + b2_ref[...]

    # Three CMCosConv layers per stream; adjacencies stay resident in VMEM.
    xb = out
    xf = out
    for i in range(3):   # static unroll: 3 tiny 32x32 layers
        xb = jnp.dot(jnp.dot(adj_b, xb, preferred_element_type=jnp.float32),
                     wb_ref[i], preferred_element_type=jnp.float32) + bb_ref[i]
        xf = jnp.dot(jnp.dot(adj_f, xf, preferred_element_type=jnp.float32),
                     wf_ref[i], preferred_element_type=jnp.float32) + bf_ref[i]

    # node_projection + gcn_projection_body + gcn_projection_face (+ summed biases)
    scores = (jnp.dot(out, wp_ref[0], preferred_element_type=jnp.float32)
              + jnp.dot(xb, wp_ref[1], preferred_element_type=jnp.float32)
              + jnp.dot(xf, wp_ref[2], preferred_element_type=jnp.float32)
              + scal_ref[1])
    o_ref[...] = scores


# ------------------------------- wrapper ----------------------------------- #

def pack_params(p):
    """Fold BatchNorm (eval) into Linear(2,32) and pack small params into a few arrays."""
    scale = p['bn_gamma'] * jax.lax.rsqrt(p['bn_rv'] + BN_EPS)           # [1,32]
    w1f = p['mlp_w1'] * scale
    b1f = (p['mlp_b1'] - p['bn_rm']) * scale + p['bn_beta']
    scalars = jnp.concatenate([
        p['prelu_a'].reshape(1),
        (p['node_b'] + p['proj_body_b'] + p['proj_face_b']).reshape(1),
    ]).astype(jnp.float32)
    return {
        'scalars': scalars,
        'w1': w1f, 'b1': b1f,
        'w2': p['mlp_w2'], 'b2': p['mlp_b2'],
        'wb': jnp.stack([p[f'body{i}_w'] for i in range(3)]),            # [3,32,32]
        'bb': jnp.stack([p[f'body{i}_b'] for i in range(3)]),            # [3,1,32]
        'wf': jnp.stack([p[f'face{i}_w'] for i in range(3)]),            # [3,32,32]
        'bf': jnp.stack([p[f'face{i}_b'] for i in range(3)]),            # [3,1,32]
        'wp': jnp.stack([p['node_w'], p['proj_body_w'], p['proj_face_w']]),  # [3,32,1]
    }


def gcn3_forward(packed, x, visual_body, visual_face):
    """x: raw node features [N, 2]; visual_body: [N, 2048]; visual_face: [N, 512]."""
    n = x.shape[0]
    # bf16 for the D=2048 / D=512 Gram contractions (f32 accumulation in-kernel).
    vb = visual_body.astype(jnp.bfloat16)
    vf = visual_face.astype(jnp.bfloat16)
    # NOTE: everything is kept resident in VMEM; for very large N this kernel
    # would need a node-block grid (flash-style adjacency tiles), see notes.
    args = (packed['scalars'], x, vb, vf,
            packed['w1'], packed['b1'], packed['w2'], packed['b2'],
            packed['wb'], packed['bb'], packed['wf'], packed['bf'],
            packed['wp'])
    in_specs = ([pl.BlockSpec(memory_space=pltpu.MemorySpace.SMEM)]
                + [pl.BlockSpec(memory_space=pltpu.MemorySpace.VMEM)] * (len(args) - 1))
    out = pl.pallas_call(
        gcn3_fused_kernel,
        out_shape=jax.ShapeDtypeStruct((n, 1), jnp.float32),
        in_specs=in_specs,
        out_specs=pl.BlockSpec(memory_space=pltpu.MemorySpace.VMEM),
    )(*args)
    return out[:, 0]                         # .squeeze() in the PyTorch forward


# ------------------------------ parameters --------------------------------- #

def _init_linear(key, in_dim, out_dim):
    kw, kb = jax.random.split(key)
    w = jax.random.normal(kw, (in_dim, out_dim), jnp.float32) * 0.1
    b = jax.random.normal(kb, (1, out_dim), jnp.float32) * 0.1
    return w, b


def init_params(key):
    keys = jax.random.split(key, 11)
    p = {}
    p['mlp_w1'], p['mlp_b1'] = _init_linear(keys[0], 2, 32)
    p['bn_gamma'] = jnp.ones((1, 32), jnp.float32)
    p['bn_beta'] = jnp.zeros((1, 32), jnp.float32)
    p['bn_rm'] = jnp.zeros((1, 32), jnp.float32)
    p['bn_rv'] = jnp.ones((1, 32), jnp.float32)
    p['prelu_a'] = jnp.full((1, 1), 0.25, jnp.float32)   # PReLU default init
    p['mlp_w2'], p['mlp_b2'] = _init_linear(keys[1], 32, 32)
    p['node_w'], p['node_b'] = _init_linear(keys[2], 32, 1)
    for i in range(3):
        p[f'body{i}_w'], p[f'body{i}_b'] = _init_linear(keys[3 + i], 32, 32)
        p[f'face{i}_w'], p[f'face{i}_b'] = _init_linear(keys[6 + i], 32, 32)
    p['proj_body_w'], p['proj_body_b'] = _init_linear(keys[9], 32, 1)
    p['proj_face_w'], p['proj_face_b'] = _init_linear(keys[10], 32, 1)
    return p


if __name__ == "__main__":
    key = jax.random.PRNGKey(0)
    k_x, k_vb, k_vf, k_p = jax.random.split(key, 4)

    N = 8                                    # nodes in the batched graph
    x = jax.random.normal(k_x, (N, 2), jnp.float32)            # raw 2-d node feats
    visual_body = jax.random.normal(k_vb, (N, 2048), jnp.float32)
    visual_face = jax.random.normal(k_vf, (N, 512), jnp.float32)

    params = init_params(k_p)
    packed = pack_params(params)             # BN folding + param packing, done once

    out = jax.jit(gcn3_forward)(packed, x, visual_body, visual_face)
    out = jax.block_until_ready(out)
    assert out.shape == (N,) and out.dtype == jnp.float32
    print("KERNEL_OK")
</pallas_src>

<mosaic_0001>
module attributes {stable_mosaic.version = 11 : i64} {
  func.func @gcn3_fused_kernel(%arg0: memref<2xf32, #tpu.memory_space<smem>>, %arg1: memref<8x2xf32, #tpu.memory_space<vmem>>, %arg2: memref<8x2048xbf16, #tpu.memory_space<vmem>>, %arg3: memref<8x512xbf16, #tpu.memory_space<vmem>>, %arg4: memref<2x32xf32, #tpu.memory_space<vmem>>, %arg5: memref<1x32xf32, #tpu.memory_space<vmem>>, %arg6: memref<32x32xf32, #tpu.memory_space<vmem>>, %arg7: memref<1x32xf32, #tpu.memory_space<vmem>>, %arg8: memref<3x32x32xf32, #tpu.memory_space<vmem>>, %arg9: memref<3x1x32xf32, #tpu.memory_space<vmem>>, %arg10: memref<3x32x32xf32, #tpu.memory_space<vmem>>, %arg11: memref<3x1x32xf32, #tpu.memory_space<vmem>>, %arg12: memref<3x32x1xf32, #tpu.memory_space<vmem>>, %arg13: memref<8x1xf32, #tpu.memory_space<vmem>>) attributes {dimension_semantics = [], scalar_prefetch = 0 : i64, scratch_operands = 0 : i64, tpu.core_type = #tpu.core_type<tc>} {
    %c0 = arith.constant 0 : index
    %c0_0 = arith.constant 0 : index
    %0 = vector.load %arg2[%c0, %c0_0] : memref<8x2048xbf16, #tpu.memory_space<vmem>>, vector<8x2048xbf16>
    %cst = arith.constant dense<0.000000e+00> : vector<8x8xf32>
    %1 = tpu.matmul %0, %0, %cst {dimension_numbers = #tpu.dot_dimension_numbers<[1], [1], [0], [0], [0, 0, 1, 0], [], []>} : vector<8x2048xbf16>, vector<8x2048xbf16>, vector<8x8xf32> -> vector<8x8xf32>
    %2 = tpu.iota {dimensions = array<i32: 0>} : vector<8x8xi32>
    %3 = tpu.iota {dimensions = array<i32: 1>} : vector<8x8xi32>
    %4 = arith.cmpi eq, %2, %3 : vector<8x8xi32>
    %cst_1 = arith.constant 0.000000e+00 : f32
    %5 = vector.broadcast %cst_1 : f32 to vector<8x8xf32>
    %6 = arith.select %4, %1, %5 : vector<8x8xi1>, vector<8x8xf32>
    %cst_2 = arith.constant dense<0.000000e+00> : vector<8xf32>
    %7 = vector.multi_reduction <add>, %6, %cst_2 [1] : vector<8x8xf32> to vector<8xf32>
    %8 = vector.shape_cast %7 : vector<8xf32> to vector<8x1xf32>
    %9 = math.sqrt %8 : vector<8x1xf32>
    %cst_3 = arith.constant dense<0.000000e+00> : vector<8xf32>
    %10 = vector.multi_reduction <add>, %6, %cst_3 [0] : vector<8x8xf32> to vector<8xf32>
    %11 = vector.shape_cast %10 : vector<8xf32> to vector<1x8xf32>
    %12 = math.sqrt %11 : vector<1x8xf32>
    %cst_4 = arith.constant 9.99999993E-9 : f32
    %13 = vector.broadcast %cst_4 : f32 to vector<8x1xf32>
    %14 = arith.maximumf %9, %13 : vector<8x1xf32>
    %cst_5 = arith.constant 1.000000e+00 : f32
    %15 = vector.broadcast %cst_5 : f32 to vector<8x1xf32>
    %16 = arith.divf %15, %14 : vector<8x1xf32>
    %cst_6 = arith.constant 9.99999993E-9 : f32
    %17 = vector.broadcast %cst_6 : f32 to vector<1x8xf32>
    %18 = arith.maximumf %12, %17 : vector<1x8xf32>
    %cst_7 = arith.constant 1.000000e+00 : f32
    %19 = vector.broadcast %cst_7 : f32 to vector<1x8xf32>
    %20 = arith.divf %19, %18 : vector<1x8xf32>
    %21 = vector.broadcast %16 : vector<8x1xf32> to vector<8x8xf32>
    %22 = arith.mulf %1, %21 : vector<8x8xf32>
    %23 = vector.broadcast %20 : vector<1x8xf32> to vector<8x8xf32>
    %24 = arith.mulf %22, %23 : vector<8x8xf32>
    %c0_8 = arith.constant 0 : index
    %c0_9 = arith.constant 0 : index
    %25 = vector.load %arg3[%c0_8, %c0_9] : memref<8x512xbf16, #tpu.memory_space<vmem>>, vector<8x512xbf16>
    %cst_10 = arith.constant dense<0.000000e+00> : vector<8x8xf32>
    %26 = tpu.matmul %25, %25, %cst_10 {dimension_numbers = #tpu.dot_dimension_numbers<[1], [1], [0], [0], [0, 0, 1, 0], [], []>} : vector<8x512xbf16>, vector<8x512xbf16>, vector<8x8xf32> -> vector<8x8xf32>
    %27 = tpu.iota {dimensions = array<i32: 0>} : vector<8x8xi32>
    %28 = tpu.iota {dimensions = array<i32: 1>} : vector<8x8xi32>
    %29 = arith.cmpi eq, %27, %28 : vector<8x8xi32>
    %cst_11 = arith.constant 0.000000e+00 : f32
    %30 = vector.broadcast %cst_11 : f32 to vector<8x8xf32>
    %31 = arith.select %29, %26, %30 : vector<8x8xi1>, vector<8x8xf32>
    %cst_12 = arith.constant dense<0.000000e+00> : vector<8xf32>
    %32 = vector.multi_reduction <add>, %31, %cst_12 [1] : vector<8x8xf32> to vector<8xf32>
    %33 = vector.shape_cast %32 : vector<8xf32> to vector<8x1xf32>
    %34 = math.sqrt %33 : vector<8x1xf32>
    %cst_13 = arith.constant dense<0.000000e+00> : vector<8xf32>
    %35 = vector.multi_reduction <add>, %31, %cst_13 [0] : vector<8x8xf32> to vector<8xf32>
    %36 = vector.shape_cast %35 : vector<8xf32> to vector<1x8xf32>
    %37 = math.sqrt %36 : vector<1x8xf32>
    %cst_14 = arith.constant 9.99999993E-9 : f32
    %38 = vector.broadcast %cst_14 : f32 to vector<8x1xf32>
    %39 = arith.maximumf %34, %38 : vector<8x1xf32>
    %cst_15 = arith.constant 1.000000e+00 : f32
    %40 = vector.broadcast %cst_15 : f32 to vector<8x1xf32>
    %41 = arith.divf %40, %39 : vector<8x1xf32>
    %cst_16 = arith.constant 9.99999993E-9 : f32
    %42 = vector.broadcast %cst_16 : f32 to vector<1x8xf32>
    %43 = arith.maximumf %37, %42 : vector<1x8xf32>
    %cst_17 = arith.constant 1.000000e+00 : f32
    %44 = vector.broadcast %cst_17 : f32 to vector<1x8xf32>
    %45 = arith.divf %44, %43 : vector<1x8xf32>
    %46 = vector.broadcast %41 : vector<8x1xf32> to vector<8x8xf32>
    %47 = arith.mulf %26, %46 : vector<8x8xf32>
    %48 = vector.broadcast %45 : vector<1x8xf32> to vector<8x8xf32>
    %49 = arith.mulf %47, %48 : vector<8x8xf32>
    %c0_18 = arith.constant 0 : index
    %c0_19 = arith.constant 0 : index
    %50 = vector.load %arg1[%c0_18, %c0_19] : memref<8x2xf32, #tpu.memory_space<vmem>>, vector<8x2xf32>
    %c0_20 = arith.constant 0 : index
    %c0_21 = arith.constant 0 : index
    %51 = vector.load %arg4[%c0_20, %c0_21] : memref<2x32xf32, #tpu.memory_space<vmem>>, vector<2x32xf32>
    %cst_22 = arith.constant dense<0.000000e+00> : vector<8x32xf32>
    %52 = tpu.matmul %50, %51, %cst_22 {dimension_numbers = #tpu.dot_dimension_numbers<[1], [0], [0], [1], [0, 0, 1, 1], [], []>} : vector<8x2xf32>, vector<2x32xf32>, vector<8x32xf32> -> vector<8x32xf32>
    %c0_23 = arith.constant 0 : index
    %c0_24 = arith.constant 0 : index
    %53 = vector.load %arg5[%c0_23, %c0_24] : memref<1x32xf32, #tpu.memory_space<vmem>>, vector<1x32xf32>
    %54 = vector.broadcast %53 : vector<1x32xf32> to vector<8x32xf32>
    %55 = arith.addf %52, %54 : vector<8x32xf32>
    %c0_25 = arith.constant 0 : index
    %56 = memref.load %arg0[%c0_25] : memref<2xf32, #tpu.memory_space<smem>>
    %cst_26 = arith.constant 0.000000e+00 : f32
    %57 = vector.broadcast %cst_26 : f32 to vector<8x32xf32>
    %58 = arith.cmpf oge, %55, %57 : vector<8x32xf32>
    %59 = vector.broadcast %56 : f32 to vector<8x32xf32>
    %60 = arith.mulf %59, %55 : vector<8x32xf32>
    %61 = arith.select %58, %55, %60 : vector<8x32xi1>, vector<8x32xf32>
    %c0_27 = arith.constant 0 : index
    %c0_28 = arith.constant 0 : index
    %62 = vector.load %arg6[%c0_27, %c0_28] : memref<32x32xf32, #tpu.memory_space<vmem>>, vector<32x32xf32>
    %cst_29 = arith.constant dense<0.000000e+00> : vector<8x32xf32>
    %63 = tpu.matmul %61, %62, %cst_29 {dimension_numbers = #tpu.dot_dimension_numbers<[1], [0], [0], [1], [0, 0, 1, 1], [], []>} : vector<8x32xf32>, vector<32x32xf32>, vector<8x32xf32> -> vector<8x32xf32>
    %c0_30 = arith.constant 0 : index
    %c0_31 = arith.constant 0 : index
    %64 = vector.load %arg7[%c0_30, %c0_31] : memref<1x32xf32, #tpu.memory_space<vmem>>, vector<1x32xf32>
    %65 = vector.broadcast %64 : vector<1x32xf32> to vector<8x32xf32>
    %66 = arith.addf %63, %65 : vector<8x32xf32>
    %cst_32 = arith.constant dense<0.000000e+00> : vector<8x32xf32>
    %67 = tpu.matmul %24, %66, %cst_32 {dimension_numbers = #tpu.dot_dimension_numbers<[1], [0], [0], [1], [0, 0, 1, 1], [], []>} : vector<8x8xf32>, vector<8x32xf32>, vector<8x32xf32> -> vector<8x32xf32>
    %c0_33 = arith.constant 0 : index
    %c0_34 = arith.constant 0 : index
    %c0_35 = arith.constant 0 : index
    %68 = vector.load %arg8[%c0_33, %c0_34, %c0_35] : memref<3x32x32xf32, #tpu.memory_space<vmem>>, vector<1x32x32xf32>
    %69 = vector.shape_cast %68 : vector<1x32x32xf32> to vector<32x32xf32>
    %cst_36 = arith.constant dense<0.000000e+00> : vector<8x32xf32>
    %70 = tpu.matmul %67, %69, %cst_36 {dimension_numbers = #tpu.dot_dimension_numbers<[1], [0], [0], [1], [0, 0, 1, 1], [], []>} : vector<8x32xf32>, vector<32x32xf32>, vector<8x32xf32> -> vector<8x32xf32>
    %c0_37 = arith.constant 0 : index
    %c0_38 = arith.constant 0 : index
    %c0_39 = arith.constant 0 : index
    %71 = vector.load %arg9[%c0_37, %c0_38, %c0_39] : memref<3x1x32xf32, #tpu.memory_space<vmem>>, vector<1x1x32xf32>
    %72 = vector.shape_cast %71 : vector<1x1x32xf32> to vector<1x32xf32>
    %73 = vector.broadcast %72 : vector<1x32xf32> to vector<8x32xf32>
    %74 = arith.addf %70, %73 : vector<8x32xf32>
    %cst_40 = arith.constant dense<0.000000e+00> : vector<8x32xf32>
    %75 = tpu.matmul %49, %66, %cst_40 {dimension_numbers = #tpu.dot_dimension_numbers<[1], [0], [0], [1], [0, 0, 1, 1], [], []>} : vector<8x8xf32>, vector<8x32xf32>, vector<8x32xf32> -> vector<8x32xf32>
    %c0_41 = arith.constant 0 : index
    %c0_42 = arith.constant 0 : index
    %c0_43 = arith.constant 0 : index
    %76 = vector.load %arg10[%c0_41, %c0_42, %c0_43] : memref<3x32x32xf32, #tpu.memory_space<vmem>>, vector<1x32x32xf32>
    %77 = vector.shape_cast %76 : vector<1x32x32xf32> to vector<32x32xf32>
    %cst_44 = arith.constant dense<0.000000e+00> : vector<8x32xf32>
    %78 = tpu.matmul %75, %77, %cst_44 {dimension_numbers = #tpu.dot_dimension_numbers<[1], [0], [0], [1], [0, 0, 1, 1], [], []>} : vector<8x32xf32>, vector<32x32xf32>, vector<8x32xf32> -> vector<8x32xf32>
    %c0_45 = arith.constant 0 : index
    %c0_46 = arith.constant 0 : index
    %c0_47 = arith.constant 0 : index
    %79 = vector.load %arg11[%c0_45, %c0_46, %c0_47] : memref<3x1x32xf32, #tpu.memory_space<vmem>>, vector<1x1x32xf32>
    %80 = vector.shape_cast %79 : vector<1x1x32xf32> to vector<1x32xf32>
    %81 = vector.broadcast %80 : vector<1x32xf32> to vector<8x32xf32>
    %82 = arith.addf %78, %81 : vector<8x32xf32>
    %cst_48 = arith.constant dense<0.000000e+00> : vector<8x32xf32>
    %83 = tpu.matmul %24, %74, %cst_48 {dimension_numbers = #tpu.dot_dimension_numbers<[1], [0], [0], [1], [0, 0, 1, 1], [], []>} : vector<8x8xf32>, vector<8x32xf32>, vector<8x32xf32> -> vector<8x32xf32>
    %c1 = arith.constant 1 : index
    %c0_49 = arith.constant 0 : index
    %c0_50 = arith.constant 0 : index
    %84 = vector.load %arg8[%c1, %c0_49, %c0_50] : memref<3x32x32xf32, #tpu.memory_space<vmem>>, vector<1x32x32xf32>
    %85 = vector.shape_cast %84 : vector<1x32x32xf32> to vector<32x32xf32>
    %cst_51 = arith.constant dense<0.000000e+00> : vector<8x32xf32>
    %86 = tpu.matmul %83, %85, %cst_51 {dimension_numbers = #tpu.dot_dimension_numbers<[1], [0], [0], [1], [0, 0, 1, 1], [], []>} : vector<8x32xf32>, vector<32x32xf32>, vector<8x32xf32> -> vector<8x32xf32>
    %c1_52 = arith.constant 1 : index
    %c0_53 = arith.constant 0 : index
    %c0_54 = arith.constant 0 : index
    %87 = vector.load %arg9[%c1_52, %c0_53, %c0_54] : memref<3x1x32xf32, #tpu.memory_space<vmem>>, vector<1x1x32xf32>
    %88 = vector.shape_cast %87 : vector<1x1x32xf32> to vector<1x32xf32>
    %89 = vector.broadcast %88 : vector<1x32xf32> to vector<8x32xf32>
    %90 = arith.addf %86, %89 : vector<8x32xf32>
    %cst_55 = arith.constant dense<0.000000e+00> : vector<8x32xf32>
    %91 = tpu.matmul %49, %82, %cst_55 {dimension_numbers = #tpu.dot_dimension_numbers<[1], [0], [0], [1], [0, 0, 1, 1], [], []>} : vector<8x8xf32>, vector<8x32xf32>, vector<8x32xf32> -> vector<8x32xf32>
    %c1_56 = arith.constant 1 : index
    %c0_57 = arith.constant 0 : index
    %c0_58 = arith.constant 0 : index
    %92 = vector.load %arg10[%c1_56, %c0_57, %c0_58] : memref<3x32x32xf32, #tpu.memory_space<vmem>>, vector<1x32x32xf32>
    %93 = vector.shape_cast %92 : vector<1x32x32xf32> to vector<32x32xf32>
    %cst_59 = arith.constant dense<0.000000e+00> : vector<8x32xf32>
    %94 = tpu.matmul %91, %93, %cst_59 {dimension_numbers = #tpu.dot_dimension_numbers<[1], [0], [0], [1], [0, 0, 1, 1], [], []>} : vector<8x32xf32>, vector<32x32xf32>, vector<8x32xf32> -> vector<8x32xf32>
    %c1_60 = arith.constant 1 : index
    %c0_61 = arith.constant 0 : index
    %c0_62 = arith.constant 0 : index
    %95 = vector.load %arg11[%c1_60, %c0_61, %c0_62] : memref<3x1x32xf32, #tpu.memory_space<vmem>>, vector<1x1x32xf32>
    %96 = vector.shape_cast %95 : vector<1x1x32xf32> to vector<1x32xf32>
    %97 = vector.broadcast %96 : vector<1x32xf32> to vector<8x32xf32>
    %98 = arith.addf %94, %97 : vector<8x32xf32>
    %cst_63 = arith.constant dense<0.000000e+00> : vector<8x32xf32>
    %99 = tpu.matmul %24, %90, %cst_63 {dimension_numbers = #tpu.dot_dimension_numbers<[1], [0], [0], [1], [0, 0, 1, 1], [], []>} : vector<8x8xf32>, vector<8x32xf32>, vector<8x32xf32> -> vector<8x32xf32>
    %c2 = arith.constant 2 : index
    %c0_64 = arith.constant 0 : index
    %c0_65 = arith.constant 0 : index
    %100 = vector.load %arg8[%c2, %c0_64, %c0_65] : memref<3x32x32xf32, #tpu.memory_space<vmem>>, vector<1x32x32xf32>
    %101 = vector.shape_cast %100 : vector<1x32x32xf32> to vector<32x32xf32>
    %cst_66 = arith.constant dense<0.000000e+00> : vector<8x32xf32>
    %102 = tpu.matmul %99, %101, %cst_66 {dimension_numbers = #tpu.dot_dimension_numbers<[1], [0], [0], [1], [0, 0, 1, 1], [], []>} : vector<8x32xf32>, vector<32x32xf32>, vector<8x32xf32> -> vector<8x32xf32>
    %c2_67 = arith.constant 2 : index
    %c0_68 = arith.constant 0 : index
    %c0_69 = arith.constant 0 : index
    %103 = vector.load %arg9[%c2_67, %c0_68, %c0_69] : memref<3x1x32xf32, #tpu.memory_space<vmem>>, vector<1x1x32xf32>
    %104 = vector.shape_cast %103 : vector<1x1x32xf32> to vector<1x32xf32>
    %105 = vector.broadcast %104 : vector<1x32xf32> to vector<8x32xf32>
    %106 = arith.addf %102, %105 : vector<8x32xf32>
    %cst_70 = arith.constant dense<0.000000e+00> : vector<8x32xf32>
    %107 = tpu.matmul %49, %98, %cst_70 {dimension_numbers = #tpu.dot_dimension_numbers<[1], [0], [0], [1], [0, 0, 1, 1], [], []>} : vector<8x8xf32>, vector<8x32xf32>, vector<8x32xf32> -> vector<8x32xf32>
    %c2_71 = arith.constant 2 : index
    %c0_72 = arith.constant 0 : index
    %c0_73 = arith.constant 0 : index
    %108 = vector.load %arg10[%c2_71, %c0_72, %c0_73] : memref<3x32x32xf32, #tpu.memory_space<vmem>>, vector<1x32x32xf32>
    %109 = vector.shape_cast %108 : vector<1x32x32xf32> to vector<32x32xf32>
    %cst_74 = arith.constant dense<0.000000e+00> : vector<8x32xf32>
    %110 = tpu.matmul %107, %109, %cst_74 {dimension_numbers = #tpu.dot_dimension_numbers<[1], [0], [0], [1], [0, 0, 1, 1], [], []>} : vector<8x32xf32>, vector<32x32xf32>, vector<8x32xf32> -> vector<8x32xf32>
    %c2_75 = arith.constant 2 : index
    %c0_76 = arith.constant 0 : index
    %c0_77 = arith.constant 0 : index
    %111 = vector.load %arg11[%c2_75, %c0_76, %c0_77] : memref<3x1x32xf32, #tpu.memory_space<vmem>>, vector<1x1x32xf32>
    %112 = vector.shape_cast %111 : vector<1x1x32xf32> to vector<1x32xf32>
    %113 = vector.broadcast %112 : vector<1x32xf32> to vector<8x32xf32>
    %114 = arith.addf %110, %113 : vector<8x32xf32>
    %c0_78 = arith.constant 0 : index
    %c0_79 = arith.constant 0 : index
    %c0_80 = arith.constant 0 : index
    %115 = vector.load %arg12[%c0_78, %c0_79, %c0_80] : memref<3x32x1xf32, #tpu.memory_space<vmem>>, vector<1x32x1xf32>
    %116 = vector.shape_cast %115 : vector<1x32x1xf32> to vector<32x1xf32>
    %cst_81 = arith.constant dense<0.000000e+00> : vector<8x1xf32>
    %117 = tpu.matmul %66, %116, %cst_81 {dimension_numbers = #tpu.dot_dimension_numbers<[1], [0], [0], [1], [0, 0, 1, 1], [], []>} : vector<8x32xf32>, vector<32x1xf32>, vector<8x1xf32> -> vector<8x1xf32>
    %c1_82 = arith.constant 1 : index
    %c0_83 = arith.constant 0 : index
    %c0_84 = arith.constant 0 : index
    %118 = vector.load %arg12[%c1_82, %c0_83, %c0_84] : memref<3x32x1xf32, #tpu.memory_space<vmem>>, vector<1x32x1xf32>
    %119 = vector.shape_cast %118 : vector<1x32x1xf32> to vector<32x1xf32>
    %cst_85 = arith.constant dense<0.000000e+00> : vector<8x1xf32>
    %120 = tpu.matmul %106, %119, %cst_85 {dimension_numbers = #tpu.dot_dimension_numbers<[1], [0], [0], [1], [0, 0, 1, 1], [], []>} : vector<8x32xf32>, vector<32x1xf32>, vector<8x1xf32> -> vector<8x1xf32>
    %121 = arith.addf %117, %120 : vector<8x1xf32>
    %c2_86 = arith.constant 2 : index
    %c0_87 = arith.constant 0 : index
    %c0_88 = arith.constant 0 : index
    %122 = vector.load %arg12[%c2_86, %c0_87, %c0_88] : memref<3x32x1xf32, #tpu.memory_space<vmem>>, vector<1x32x1xf32>
    %123 = vector.shape_cast %122 : vector<1x32x1xf32> to vector<32x1xf32>
    %cst_89 = arith.constant dense<0.000000e+00> : vector<8x1xf32>
    %124 = tpu.matmul %114, %123, %cst_89 {dimension_numbers = #tpu.dot_dimension_numbers<[1], [0], [0], [1], [0, 0, 1, 1], [], []>} : vector<8x32xf32>, vector<32x1xf32>, vector<8x1xf32> -> vector<8x1xf32>
    %125 = arith.addf %121, %124 : vector<8x1xf32>
    %c1_90 = arith.constant 1 : index
    %126 = memref.load %arg0[%c1_90] : memref<2xf32, #tpu.memory_space<smem>>
    %127 = vector.broadcast %126 : f32 to vector<8x1xf32>
    %128 = arith.addf %125, %127 : vector<8x1xf32>
    %c0_91 = arith.constant 0 : index
    %c0_92 = arith.constant 0 : index
    %129 = vector.load %arg13[%c0_91, %c0_92] : memref<8x1xf32, #tpu.memory_space<vmem>>, vector<8x1xf32>
    tpu.vector_store %arg13[%c0_91, %c0_92], %128 {strides = array<i32>} : memref<8x1xf32, #tpu.memory_space<vmem>>, vector<8x1xf32>,
    return
  }
}

</mosaic_0001>

<bundles_post_ra>
// kernel: gcn3_forward.1
= control target key start
LH: loop header
LB: loop body
LE: loop exit
PB: predicated region body
PF: predicated region fallthrough
CT: control target
= control target key end

     0   :  { %18 = vsyncpa [#allocation3], 0  ;;  %s2755_s0 = inlined_call_operand.vmem [shape: f32[2], index: 0, kind: input, shape index: {}]   ;;  %s2756_s1 = inlined_call_operand.vmem [shape: f32[8,2], index: 1, kind: input, shape index: {}]   ;;  %s2757_s2 = inlined_call_operand.vmem [shape: bf16[8,2048], index: 2, kind: input, shape index: {}]   ;;  %s2758_s3 = inlined_call_operand.vmem [shape: bf16[8,512], index: 3, kind: input, shape index: {}]   ;;  %s2759_s4 = inlined_call_operand.vmem [shape: f32[2,32], index: 4, kind: input, shape index: {}]   ;;  %s2760_s5 = inlined_call_operand.vmem [shape: f32[1,32], index: 5, kind: input, shape index: {}]   ;;  %s2761_s6 = inlined_call_operand.vmem [shape: f32[32,32], index: 6, kind: input, shape index: {}]   ;;  %s2762_s7 = inlined_call_operand.vmem [shape: f32[1,32], index: 7, kind: input, shape index: {}]   ;;  %s2763_s8 = inlined_call_operand.vmem [shape: f32[3,32,32], index: 8, kind: input, shape index: {}]   ;;  %s2764_s9 = inlined_call_operand.vmem [shape: f32[3,1,32], index: 9, kind: input, shape index: {}]   ;;  %s2765_s10 = inlined_call_operand.vmem [shape: f32[3,32,32], index: 10, kind: input, shape index: {}]   ;;  %s2766_s11 = inlined_call_operand.vmem [shape: f32[3,1,32], index: 11, kind: input, shape index: {}]   ;;  %s2767_s12 = inlined_call_operand.vmem [shape: f32[3,32,1], index: 12, kind: input, shape index: {}]   ;;  %s2768_s13 = inlined_call_operand.vmem [shape: f32[8,1], index: 13, kind: output, shape index: {}]  }
   0x1   :  { %s25_s27 = sshll.u32 %s2755_s0, 4  ;;  %s26_s27 = int_to_ptr.vmem [resolvable:$true] %s25_s27 }
   0x2   :  { %s2383_s28 = scalar_lea.vmem %s26_s27, 16  ;;  %p2388_p1 = scmp.lt.s32.totalorder %s26_s27, %s26_s27 }
   0x3   :  { %p2384_p0 = scmp.ne.s32.totalorder %s26_s27, %s2383_s28  ;;  %p2389_p2 = scmp.lt.s32.totalorder %s2383_s28, %s2383_s28 }
   0x5   :  { %p2390_p3 = por %p2389_p2, %p2388_p1 }
   0x7   :  { %p2391_p4 = pnand %p2390_p3, %p2384_p0 }
   0x9   :  { %2394 = shalt.err (!%p2391_p4)
}
   0xa   :  { %s2397_s29 = smov [#allocation2]  }
   0xb   :  { %28 = dma.vmem_to_smem %s26_s27, 16, %s2397_s29, [#allocation3]  }
   0xc   :  { %2395 = dma.done.wait [#allocation3], 16  }
   0xd   :  { %2396 = vsyncadd [#allocation3], 4294967280 }
   0xe   :  { %56 = sfence }
   0xf   :  { %v58_v0 = vld [vmem:[%s2757_s2] sm:$0xff]  ;;  %v59_v2 = vld [vmem:[%s2757_s2 + $0x8] sm:$0xff]  ;;  %v60_v10 = vld [vmem:[%s2757_s2 + $0x10] sm:$0xff]  ;;  %v2398_v14 = vmov 0.0   ;;  %vm621_vm0 = vcmask 1041408   ;;  %vm2399_vm1 = vmmov 0   ;;  %v442_v51 = vlaneseq }
  0x10   :  { %v480_v1 = vld [vmem:[%s2758_s3] sm:$0xff]  ;;  %v1968_v3 = vcombine.high %v58_v0, %v58_v0  ;;  %v1967_v5 = vcombine.low %v58_v0, %v58_v0  ;;  %v481_v7 = vld [vmem:[%s2758_s3 + $0x8] sm:$0xff]  ;;  %v1970_v8 = vcombine.high %v59_v2, %v59_v2  ;;  %v1969_v11 = vcombine.low %v59_v2, %v59_v2  ;;  %v61_v15 = vld [vmem:[%s2757_s2 + $0x18] sm:$0xff]  ;;  %s695_s3 = sld [smem:[#allocation2]]  ;;  %s2041_s28 = sld [smem:[#allocation2 + $0x1]] }
  0x11   :  { %v1984_v4 = vcombine.high %v480_v1, %v480_v1  ;;  %v1983_v6 = vcombine.low %v480_v1, %v480_v1  ;;  %v1986_v9 = vcombine.high %v481_v7, %v481_v7  ;;  %v1985_v12 = vcombine.low %v481_v7, %v481_v7  ;;  %v609_v18 = vld [vmem:[%s2759_s4] sm:$0x3]  ;;  %v63_v23 = vld [vmem:[%s2757_s2 + $0x28] sm:$0xff]  ;;  %v64_v26 = vld [vmem:[%s2757_s2 + $0x30] sm:$0xff] }
  0x12   :  { %122 = vmatprep.subr.bf16.mxu0 %v1968_v3  ;;  %154 = vmatprep.mubr.bf16.mxu0 %v1968_v3  ;;  %v1972_v13 = vcombine.high %v60_v10, %v60_v10  ;;  %v1971_v16 = vcombine.low %v60_v10, %v60_v10  ;;  %v1974_v17 = vcombine.high %v61_v15, %v61_v15  ;;  %v608_v19 = vld [vmem:[%s2756_s1] sm:$0xff]  ;;  %vm617_vm2 = vcmask 15360   ;;  %v65_v29 = vld [vmem:[%s2757_s2 + $0x38] sm:$0xff]  ;;  %v701_v34 = vld [vmem:[%s2761_s6 + $0x8] sm:$0xff] }
  0x13   :  { %496 = vmatprep.subr.bf16.mxu1 %v1984_v4  ;;  %123 = vmatpush1.bf16.xpose.msra.mxu0 %v1967_v5  ;;  %v62_v20 = vld [vmem:[%s2757_s2 + $0x20] sm:$0xff]  ;;  %v1973_v21 = vcombine.low %v61_v15, %v61_v15  ;;  %v1978_v25 = vcombine.high %v63_v23, %v63_v23  ;;  %v1977_v27 = vcombine.low %v63_v23, %v63_v23  ;;  %v2400_v35 = vmov 0.0|0.0   ;;  %v702_v37 = vld [vmem:[%s2761_s6 + $0x10] sm:$0xff]  ;;  %v703_v38 = vld [vmem:[%s2761_s6 + $0x18] sm:$0xff] }
  0x14   :  { %497 = vmatpush1.bf16.xpose.msra.mxu1 %v1983_v6  ;;  %528 = vmatprep.mubr.bf16.mxu1 %v1984_v4  ;;  %v1976_v22 = vcombine.high %v62_v20, %v62_v20  ;;  %v1975_v24 = vcombine.low %v62_v20, %v62_v20  ;;  %v1980_v28 = vcombine.high %v64_v26, %v64_v26  ;;  %v700_v33 = vld [vmem:[%s2761_s6] sm:$0xff]  ;;  %vm711_vm4 = vcmask 261120   ;;  %v859_v23 = vld [vmem:[%s2763_s8 + $0x8] sm:$0xff] }
  0x15   :  { %162 = vmatprep.subr.bf16.mxu0 %v1970_v8  ;;  %536 = vmatprep.subr.bf16.mxu1 %v1986_v9  ;;  %v1979_v30 = vcombine.low %v64_v26, %v64_v26  ;;  %v1982_v31 = vcombine.high %v65_v29, %v65_v29  ;;  %v1981_v32 = vcombine.low %v65_v29, %v65_v29  ;;  %v1987_v44 = vld [vmem:[%s2760_s5] ss:$0 sm:$0xff]  ;;  %v443_v52 = vshrl.u32 %v442_v51, 7  ;;  %v860_v29 = vld [vmem:[%s2763_s8 + $0x10] sm:$0xff] }
  0x16   :  { %v2252_v36 = vpack.c.bf16 %v701_v34, %v700_v33  ;;  %v2255_v39 = vpack.c.bf16 %v703_v38, %v702_v37  ;;  %v697_v46 = vstv %s695_s3  ;;  %v445_v53 = vand.u32 127, %v442_v51  ;;  %v1990_v7 = vld [vmem:[%s2762_s7] ss:$0 sm:$0xff] }
  0x17   :  { %vm448_vm6 = vcmask 64512   ;;  %vm1960_vm15 = vcmask 7168  }
  0x18   :  { %vm446_vm5 = vcmp.eq.s32.totalorder %v443_v52, %v445_v53 }
  0x1a   :  { %155 = vmatmul.mubr.bf16.vlgmr.msra.gmra.mrb[0].mxu0 %v1967_v5 }
  0x1b   :  { %529 = vmatmul.mubr.bf16.vlgmr.msra.gmra.mrb[0].mxu1 %v1983_v6  ;;  %163 = vmatpush1.bf16.xpose.msra.mxu0 %v1969_v11 }
  0x1c   :  { %537 = vmatpush1.bf16.xpose.msra.mxu1 %v1985_v12  ;;  %194 = vmatprep.mubr.bf16.mxu0 %v1970_v8 }
  0x1d   :  { %568 = vmatprep.mubr.bf16.mxu1 %v1986_v9  ;;  %202 = vmatprep.subr.bf16.mxu0 %v1972_v13 }
  0x1e   :  { %2106 = vmatprep.subr.mxu1 %v2398_v14 }
  0x26   :  { %195 = vmatmul.mubr.bf16.vlgmr.msra.gmra.mrb[0].mxu0 %v1969_v11 }
  0x27   :  { %569 = vmatmul.mubr.bf16.vlgmr.msra.gmra.mrb[0].mxu1 %v1985_v12  ;;  %203 = vmatpush1.bf16.xpose.msra.mxu0 %v1971_v16 }
  0x28   :  { %234 = vmatprep.mubr.bf16.mxu0 %v1972_v13  ;;  %242 = vmatprep.subr.bf16.mxu0 %v1974_v17 }
  0x29   :  { %2107 = vmatpush3.msk.msra.mxu1 %vm621_vm0, %v609_v18  ;;  %2108 = vmatprep.mubr.msk.f32.mxu1 %vm2399_vm1, %v2398_v14 }
  0x2a   :  { %2251 = vmatprep.subr.bf16.mxu1 %v2400_v35 }
  0x2f   :  { %2109 = vmatmul.mubr.msk.f32.vlgmr.msra.gmra.mrb[4].mxu1 %vm617_vm2, %v608_v19 }
  0x30   :  { %2119 = vmatprep.mubr.msk.f32.mxu1 %vm2399_vm1, %v2398_v14  ;;  %2253 = vmatpush3.bf16.msra.mxu1 %v2252_v36 }
  0x31   :  { %2254 = vmatprep.subr.bf16.mxu1 %v2400_v35 }
  0x32   :  { %235 = vmatmul.mubr.bf16.vlgmr.msra.gmra.mrb[0].mxu0 %v1971_v16 }
  0x33   :  { %243 = vmatpush1.bf16.xpose.msra.mxu0 %v1973_v21  ;;  %274 = vmatprep.mubr.bf16.mxu0 %v1974_v17 }
  0x34   :  { %282 = vmatprep.subr.bf16.mxu0 %v1976_v22  ;;  %2256 = vmatpush3.bf16.msra.mxu1 %v2255_v39 }
  0x35   :  { %2122 = vmatprep.subr.mxu1 %v2398_v14 }
  0x3e   :  { %275 = vmatmul.mubr.bf16.vlgmr.msra.gmra.mrb[0].mxu0 %v1973_v21 }
  0x3f   :  { %283 = vmatpush1.bf16.xpose.msra.mxu0 %v1975_v24  ;;  %314 = vmatprep.mubr.bf16.mxu0 %v1976_v22  ;;  %v858_v22 = vld [vmem:[%s2763_s8] sm:$0xff] }
  0x40   :  { %322 = vmatprep.subr.bf16.mxu0 %v1978_v25 }
  0x4a   :  { %315 = vmatmul.mubr.bf16.vlgmr.msra.gmra.mrb[0].mxu0 %v1975_v24 }
  0x4b   :  { %323 = vmatpush1.bf16.xpose.msra.mxu0 %v1977_v27  ;;  %354 = vmatprep.mubr.bf16.mxu0 %v1978_v25 }
  0x4c   :  { %362 = vmatprep.subr.bf16.mxu0 %v1980_v28 }
  0x56   :  { %355 = vmatmul.mubr.bf16.vlgmr.msra.gmra.mrb[0].mxu0 %v1977_v27  ;;  %v2258_v27 = vpack.c.bf16 %v859_v23, %v858_v22  ;;  %v2010_v22 = vld [vmem:[%s2765_s10 + $0x38] sm:$0xff] }
  0x57   :  { %363 = vmatpush1.bf16.xpose.msra.mxu0 %v1979_v30  ;;  %394 = vmatprep.mubr.bf16.mxu0 %v1980_v28 }
  0x58   :  { %402 = vmatprep.subr.bf16.mxu0 %v1982_v31 }
  0x62   :  { %395 = vmatmul.mubr.bf16.vlgmr.msra.gmra.mrb[0].mxu0 %v1979_v30  ;;  %v861_v30 = vld [vmem:[%s2763_s8 + $0x18] sm:$0xff] }
  0x63   :  { %403 = vmatpush1.bf16.xpose.msra.mxu0 %v1981_v32  ;;  %434 = vmatprep.mubr.bf16.mxu0 %v1982_v31  ;;  %v2261_v31 = vpack.c.bf16 %v861_v30, %v860_v29  ;;  %v2016_v29 = vld [vmem:[%s2763_s8 + $0x48] sm:$0xff] }
  0x64   :  { %2170 = vmatprep.subr.mxu0 %v2398_v14 }
  0x6e   :  { %435 = vmatmul.mubr.bf16.vlgmr.msra.gmra.mrb[0].mxu0 %v1981_v32 }
  0x6f   :  { %2172 = vmatprep.mubr.msk.f32.mxu0 %vm2399_vm1, %v2398_v14 }
  0xfa   :  { %v2533_v40 = vpop.f32.mrb[0].mxu1 }
  0xfb   :  { %v572_v41 = vpop.f32.mrb[1].mxu1  ;;  %v576_v59 = vsel %vm446_vm5, %v2533_v40, 0.0 }
  0xfc   :  { %v573_v42 = vpop.f32.mrb[2].mxu1  ;;  %v577_v61 = vsel %vm448_vm6, %v576_v59, 0.0 }
  0xfd   :  { %v574_v43 = vpop.f32.mrb[3].mxu1  ;;  %v587_v32 = vrot.slane %v577_v61, 4 }
  0xff   :  { %v588_v33 = vadd.f32 %v587_v32, %v577_v61 }
 0x101   :  { %v589_v34 = vrot.slane %v588_v33, 2 }
 0x102   :  { %v691_v45 = vpop.f32.mrb[4].mxu1 }
 0x103   :  { %v692_v47 = vadd.f32 %v1987_v44, %v691_v45  ;;  %v2110_v48 = vpop.f32.mrb[5].mxu1  ;;  %v590_v36 = vadd.f32 %v589_v34, %v588_v33 }
 0x105   :  { %vm696_vm3 = vcmp.ge.f32.partialorder %v692_v47, 0.0  ;;  %v698_v49 = vmul.f32 %v697_v46, %v692_v47  ;;  %v591_v38 = vrot.slane %v590_v36, 1 }
 0x107   :  { %v699_v50 = vsel %vm696_vm3, %v692_v47, %v698_v49  ;;  %v592_v39 = vadd.f32 %v591_v38, %v590_v36  ;;  %v2018_v38 = vld [vmem:[%s2763_s8 + $0x58] sm:$0xff] }
 0x108   :  { %2120 = vmatmul.mubr.msk.f32.vlgmr.msra.gmra.mrb[6].mxu1 %vm711_vm4, %v699_v50 }
 0x109   :  { %2124 = vmatprep.mubr.msk.f32.mxu1 %vm2399_vm1, %v2398_v14  ;;  %vm595_vm13 = vcmp.eq.f32.partialorder %v592_v39, inf  ;;  %v598_v50 = vand.u32 2147483648, %v592_v39  ;;  %vm597_vm14 = vcmp.eq.f32.partialorder %v592_v39, 0.0 }
 0x141   :  { %v436_v54 = vpop.f32.mrb[0].mxu0 }
 0x142   :  { %v447_v55 = vsel %vm446_vm5, %v436_v54, 0.0  ;;  %v438_v56 = vpop.f32.mrb[1].mxu0 }
 0x143   :  { %v439_v57 = vpop.f32.mrb[2].mxu0  ;;  %v449_v58 = vsel %vm448_vm6, %v447_v55, 0.0  ;;  %v1015_v55 = vld [vmem:[%s2765_s10] sm:$0xff]  ;;  %v1016_v56 = vld [vmem:[%s2765_s10 + $0x8] sm:$0xff] }
 0x144   :  { %450 = vadd.xlane.f32.xlu0 %v449_v58  ;;  %v440_v60 = vpop.f32.mrb[3].mxu0  ;;  %v459_v62 = vrot.slane %v449_v58, 4 }
 0x145   :  { %v2264_v60 = vpack.c.bf16 %v1016_v56, %v1015_v55  ;;  %v2032_v55 = vld [vmem:[%s2767_s12 + $0x30] sm:$0xff]  ;;  %v2033_v56 = vld [vmem:[%s2767_s12 + $0x38] sm:$0xff] }
 0x146   :  { %v460_v63 = vadd.f32 %v459_v62, %v449_v58  ;;  %v1018_v62 = vld [vmem:[%s2765_s10 + $0x18] sm:$0xff] }
 0x148   :  { %578 = vadd.xlane.f32.xlu0 %v577_v61  ;;  %v461_v0 = vrot.slane %v460_v63, 2  ;;  %v1017_v61 = vld [vmem:[%s2765_s10 + $0x10] sm:$0xff] }
 0x14a   :  { %v462_v1 = vadd.f32 %v461_v0, %v460_v63  ;;  %v2267_v63 = vpack.c.bf16 %v1018_v62, %v1017_v61  ;;  %v2037_v61 = vld [vmem:[%s2767_s12 + $0x48] sm:$0xff]  ;;  %v2020_v62 = vld [vmem:[%s2764_s9 + $0x2] ss:$0 sm:$0xff] }
 0x14c   :  { %v463_v2 = vrot.slane %v462_v1, 1 }
 0x14e   :  { %v464_v3 = vadd.f32 %v463_v2, %v462_v1  ;;  %v1993_v1 = vld [vmem:[%s2764_s9] ss:$0 sm:$0xff] }
 0x150   :  { %2367 = vrsqrt.f32 %v464_v3  ;;  %vm467_vm7 = vcmp.eq.f32.partialorder %v464_v3, inf  ;;  %v470_v13 = vand.u32 2147483648, %v464_v3  ;;  %vm469_vm8 = vcmp.eq.f32.partialorder %v464_v3, 0.0 }
 0x15a   :  { %v2368_v5 = vpop.eup %2367 }
 0x15b   :  { %v466_v6 = vmul.f32 %v2368_v5, %v464_v3 }
 0x15d   :  { %v468_v11 = vsel %vm467_vm7, %v464_v3, %v466_v6  ;;  %v1999_v3 = vld [vmem:[%s2763_s8 + $0x20] sm:$0xff] }
 0x15e   :  { %v471_v17 = vsel %vm469_vm8, %v470_v13, %v468_v11  ;;  %v2002_v11 = vld [vmem:[%s2763_s8 + $0x38] sm:$0xff]  ;;  %v1996_v13 = vld [vmem:[%s2766_s11] ss:$0 sm:$0xff] }
 0x15f   :  { %v475_v21 = vmax.f32 %v471_v17, 1e-08 }
 0x1d1   :  { %v451_v4 = vpop.xlane.xlu0 %450 }
 0x1d2   :  { %2369 = vrsqrt.f32 %v451_v4  ;;  %vm454_vm9 = vcmp.eq.f32.partialorder %v451_v4, inf  ;;  %v457_v16 = vand.u32 2147483648, %v451_v4  ;;  %vm456_vm10 = vcmp.eq.f32.partialorder %v451_v4, 0.0 }
 0x1d5   :  { %v579_v37 = vpop.xlane.xlu0 %578 }
 0x1d6   :  { %vm582_vm11 = vcmp.eq.f32.partialorder %v579_v37, inf  ;;  %v585_v45 = vand.u32 2147483648, %v579_v37  ;;  %vm584_vm12 = vcmp.eq.f32.partialorder %v579_v37, 0.0 }
 0x1db   :  { %v781_v8 = vpop.f32.mrb[6].mxu1 }
 0x1dc   :  { %v2547_v9 = vadd.f32 %v1990_v7, %v781_v8  ;;  %v2121_v10 = vpop.f32.mrb[7].mxu1  ;;  %v2370_v12 = vpop.eup %2369 }
 0x1dd   :  { %v453_v15 = vmul.f32 %v2370_v12, %v451_v4  ;;  %v2001_v10 = vld [vmem:[%s2763_s8 + $0x30] sm:$0xff] }
 0x1de   :  { %2123 = vmatpush3.msra.mxu1 %v2547_v9  ;;  %v2273_v12 = vpack.c.bf16 %v2002_v11, %v2001_v10  ;;  %v2039_v10 = vld [vmem:[%s2767_s12 + $0x58] sm:$0xff] }
 0x1df   :  { %2257 = vmatprep.subr.bf16.mxu1 %v2400_v35  ;;  %v455_v18 = vsel %vm454_vm9, %v451_v4, %v453_v15  ;;  %v2000_v4 = vld [vmem:[%s2763_s8 + $0x28] sm:$0xff]  ;;  %v2007_v15 = vld [vmem:[%s2765_s10 + $0x20] sm:$0xff] }
 0x1e0   :  { %v458_v19 = vsel %vm456_vm10, %v457_v16, %v455_v18  ;;  %v2270_v8 = vpack.c.bf16 %v2000_v4, %v1999_v3  ;;  %v2008_v16 = vld [vmem:[%s2765_s10 + $0x28] sm:$0xff] }
 0x1e1   :  { %v472_v20 = vmax.f32 %v458_v19, 1e-08 }
 0x1e3   :  { %2371 = vrcp.f32 %v472_v20  ;;  %v2276_v20 = vpack.c.bf16 %v2008_v16, %v2007_v15 }
 0x1e4   :  { %2373 = vrcp.f32 %v475_v21  ;;  %v2009_v21 = vld [vmem:[%s2765_s10 + $0x30] sm:$0xff] }
 0x1e5   :  { %2375 = vrsqrt.f32 %v579_v37 }
 0x1e6   :  { %2377 = vrsqrt.f32 %v592_v39 }
 0x1ed   :  { %v2372_v24 = vpop.eup %2371 }
 0x1ee   :  { %v478_v25 = vmul.f32 %v2372_v24, %v436_v54  ;;  %v2374_v26 = vpop.eup %2373 }
 0x1ef   :  { %v2376_v41 = vpop.eup %2375 }
 0x1f0   :  { %v2557_v28 = vmul.f32 %v2374_v26, %v478_v25  ;;  %v581_v42 = vmul.f32 %v2376_v41, %v579_v37  ;;  %v2378_v43 = vpop.eup %2377  ;;  %v2279_v25 = vpack.c.bf16 %v2010_v22, %v2009_v21  ;;  %v2004_v26 = vld [vmem:[%s2764_s9 + $0x1] ss:$0 sm:$0xff] }
 0x1f1   :  { %v594_v46 = vmul.f32 %v2378_v43, %v592_v39  ;;  %v2023_v41 = vld [vmem:[%s2765_s10 + $0x40] sm:$0xff] }
 0x1f2   :  { %2125 = vmatmul.mubr.msk.f32.vlgmr.msra.gmra.mrb[8].mxu1 %vm448_vm6, %v2557_v28  ;;  %v583_v44 = vsel %vm582_vm11, %v579_v37, %v581_v42  ;;  %v2017_v37 = vld [vmem:[%s2763_s8 + $0x50] sm:$0xff]  ;;  %v2024_v42 = vld [vmem:[%s2765_s10 + $0x48] sm:$0xff]  ;;  %v2030_v43 = vld [vmem:[%s2767_s12 + $0x20] sm:$0xff] }
 0x1f3   :  { %2259 = vmatpush3.bf16.msra.mxu1 %v2258_v27  ;;  %2135 = vmatprep.mubr.msk.f32.mxu1 %vm2399_vm1, %v2398_v14  ;;  %v586_v47 = vsel %vm584_vm12, %v585_v45, %v583_v44  ;;  %v596_v49 = vsel %vm595_vm13, %v592_v39, %v594_v46  ;;  %v2015_v27 = vld [vmem:[%s2763_s8 + $0x40] sm:$0xff]  ;;  %v2285_v39 = vpack.c.bf16 %v2018_v38, %v2017_v37  ;;  %v2031_v44 = vld [vmem:[%s2767_s12 + $0x28] sm:$0xff] }
 0x1f4   :  { %2260 = vmatprep.subr.bf16.mxu1 %v2400_v35  ;;  %v600_v48 = vmax.f32 %v586_v47, 1e-08  ;;  %v599_v51 = vsel %vm597_vm14, %v598_v50, %v596_v49  ;;  %v2282_v36 = vpack.c.bf16 %v2016_v29, %v2015_v27  ;;  %v2025_v49 = vld [vmem:[%s2765_s10 + $0x50] sm:$0xff]  ;;  %v2026_v50 = vld [vmem:[%s2765_s10 + $0x58] sm:$0xff] }
 0x1f5   :  { %v603_v52 = vmax.f32 %v599_v51, 1e-08  ;;  %v2294_v51 = vpack.c.bf16 %v2031_v44, %v2030_v43 }
 0x1f6   :  { %2379 = vrcp.f32 %v600_v48  ;;  %v2288_v48 = vpack.c.bf16 %v2024_v42, %v2023_v41 }
 0x1f7   :  { %2262 = vmatpush3.bf16.msra.mxu1 %v2261_v31  ;;  %2381 = vrcp.f32 %v603_v52 }
 0x1f8   :  { %2138 = vmatprep.subr.mxu1 %v2398_v14 }
 0x200   :  { %v2380_v53 = vpop.eup %2379 }
 0x201   :  { %v606_v54 = vmul.f32 %v2380_v53, %v2533_v40  ;;  %v2382_v59 = vpop.eup %2381 }
 0x203   :  { %v2582_v40 = vmul.f32 %v2382_v59, %v606_v54  ;;  %v2291_v54 = vpack.c.bf16 %v2026_v50, %v2025_v49  ;;  %v1724_v59 = vld [vmem:[%s2767_s12 + $0x8] sm:$0xff] }
 0x2c5   :  { %v854_v57 = vpop.f32.mrb[8].mxu1 }
 0x2c6   :  { %v2126_v58 = vpop.f32.mrb[9].mxu1  ;;  %2136 = vmatmul.mubr.msk.f32.vlgmr.msra.gmra.mrb[10].mxu1 %vm711_vm4, %v854_v57  ;;  %v2297_v57 = vpack.c.bf16 %v2033_v56, %v2032_v55 }
 0x2c7   :  { %2139 = vmatpush3.msra.mxu1 %v2547_v9  ;;  %2140 = vmatprep.mubr.msk.f32.mxu1 %vm2399_vm1, %v2398_v14  ;;  %v1723_v58 = vld [vmem:[%s2767_s12] sm:$0xff] }
 0x2c8   :  { %2263 = vmatprep.subr.bf16.mxu1 %v2400_v35 }
 0x2ca   :  { %2141 = vmatmul.mubr.msk.f32.vlgmr.msra.gmra.mrb[12].mxu1 %vm448_vm6, %v2582_v40 }
 0x2cb   :  { %2265 = vmatpush3.bf16.msra.mxu1 %v2264_v60  ;;  %2151 = vmatprep.mubr.msk.f32.mxu1 %vm2399_vm1, %v2398_v14  ;;  %v2300_v60 = vpack.c.bf16 %v1724_v59, %v1723_v58 }
 0x2cc   :  { %2266 = vmatprep.subr.bf16.mxu1 %v2400_v35 }
 0x2cf   :  { %2268 = vmatpush3.bf16.msra.mxu1 %v2267_v63  ;;  %v1725_v63 = vld [vmem:[%s2767_s12 + $0x10] sm:$0xff] }
 0x2d0   :  { %2154 = vmatprep.subr.mxu1 %v2398_v14 }
 0x399   :  { %v938_v0 = vpop.f32.mrb[10].mxu1 }
 0x39a   :  { %v2137_v2 = vpop.f32.mrb[11].mxu1  ;;  %v939_v5 = vadd.f32 %v1993_v1, %v938_v0  ;;  %v1726_v0 = vld [vmem:[%s2767_s12 + $0x18] sm:$0xff] }
 0x39d   :  { %v1011_v6 = vpop.f32.mrb[12].mxu1 }
 0x39e   :  { %v2142_v7 = vpop.f32.mrb[13].mxu1  ;;  %2152 = vmatmul.mubr.msk.f32.vlgmr.msra.gmra.mrb[14].mxu1 %vm711_vm4, %v1011_v6 }
 0x39f   :  { %2155 = vmatpush3.msra.mxu1 %v939_v5  ;;  %2156 = vmatprep.mubr.msk.f32.mxu1 %vm2399_vm1, %v2398_v14  ;;  %v2303_v7 = vpack.c.bf16 %v1726_v0, %v1725_v63 }
 0x3a0   :  { %2269 = vmatprep.subr.bf16.mxu1 %v2400_v35 }
 0x3a2   :  { %2157 = vmatmul.mubr.msk.f32.vlgmr.msra.gmra.mrb[16].mxu1 %vm448_vm6, %v2557_v28 }
 0x3a3   :  { %2271 = vmatpush3.bf16.msra.mxu1 %v2270_v8  ;;  %2167 = vmatprep.mubr.msk.f32.mxu1 %vm2399_vm1, %v2398_v14  ;;  %v2038_v8 = vld [vmem:[%s2767_s12 + $0x50] sm:$0xff] }
 0x3a4   :  { %2272 = vmatprep.subr.bf16.mxu1 %v2400_v35  ;;  %v2309_v11 = vpack.c.bf16 %v2039_v10, %v2038_v8 }
 0x3a7   :  { %2274 = vmatpush3.bf16.msra.mxu1 %v2273_v12 }
 0x3a8   :  { %2275 = vmatprep.subr.bf16.mxu1 %v2400_v35 }
 0x471   :  { %v1095_v17 = vpop.f32.mrb[14].mxu1 }
 0x472   :  { %v1096_v18 = vadd.f32 %v1996_v13, %v1095_v17  ;;  %v2153_v19 = vpop.f32.mrb[15].mxu1 }
 0x474   :  { %2171 = vmatpush3.msra.mxu0 %v1096_v18 }
 0x475   :  { %v1165_v23 = vpop.f32.mrb[16].mxu1  ;;  %2173 = vmatmul.mubr.msk.f32.vlgmr.msra.gmra.mrb[4].mxu0 %vm448_vm6, %v2582_v40  ;;  %2186 = vmatprep.subr.mxu0 %v2398_v14 }
 0x476   :  { %v2158_v24 = vpop.f32.mrb[17].mxu1  ;;  %2168 = vmatmul.mubr.msk.f32.vlgmr.msra.gmra.mrb[18].mxu1 %vm711_vm4, %v1165_v23  ;;  %2188 = vmatprep.mubr.msk.f32.mxu0 %vm2399_vm1, %v2398_v14 }
 0x477   :  { %2277 = vmatpush3.bf16.msra.mxu1 %v2276_v20  ;;  %2183 = vmatprep.mubr.msk.f32.mxu1 %vm2399_vm1, %v2398_v14  ;;  %v1958_v20 = vstv %s2041_s28 }
 0x478   :  { %2278 = vmatprep.subr.bf16.mxu1 %v2400_v35 }
 0x47b   :  { %2280 = vmatpush3.bf16.msra.mxu1 %v2279_v25 }
 0x47c   :  { %2202 = vmatprep.subr.mxu1 %v2398_v14 }
 0x548   :  { %v1321_v30 = vpop.f32.mrb[4].mxu0 }
 0x549   :  { %v1251_v31 = vpop.f32.mrb[18].mxu1  ;;  %v2174_v32 = vpop.f32.mrb[5].mxu0  ;;  %2184 = vmatmul.mubr.msk.f32.vlgmr.msra.gmra.mrb[20].mxu1 %vm711_vm4, %v1321_v30 }
 0x54a   :  { %v1252_v33 = vadd.f32 %v2004_v26, %v1251_v31  ;;  %v2169_v34 = vpop.f32.mrb[19].mxu1  ;;  %2204 = vmatprep.mubr.msk.f32.mxu1 %vm2399_vm1, %v2398_v14 }
 0x54c   :  { %2187 = vmatpush3.msra.mxu0 %v1252_v33 }
 0x54d   :  { %2189 = vmatmul.mubr.msk.f32.vlgmr.msra.gmra.mrb[6].mxu0 %vm448_vm6, %v2557_v28  ;;  %2281 = vmatprep.subr.bf16.mxu0 %v2400_v35  ;;  %v2012_v28 = vld [vmem:[%s2766_s11 + $0x1] ss:$0 sm:$0xff] }
 0x54e   :  { %2283 = vmatpush3.bf16.msra.mxu0 %v2282_v36  ;;  %2199 = vmatprep.mubr.msk.f32.mxu0 %vm2399_vm1, %v2398_v14 }
 0x54f   :  { %2284 = vmatprep.subr.bf16.mxu0 %v2400_v35 }
 0x552   :  { %2286 = vmatpush3.bf16.msra.mxu0 %v2285_v39 }
 0x553   :  { %2293 = vmatprep.subr.bf16.mxu0 %v2400_v35 }
 0x61c   :  { %v1407_v45 = vpop.f32.mrb[20].mxu1 }
 0x61d   :  { %v1408_v46 = vadd.f32 %v2012_v28, %v1407_v45  ;;  %v2185_v47 = vpop.f32.mrb[21].mxu1 }
 0x61f   :  { %2203 = vmatpush3.msra.mxu1 %v1408_v46 }
 0x620   :  { %v1477_v52 = vpop.f32.mrb[6].mxu0  ;;  %2205 = vmatmul.mubr.msk.f32.vlgmr.msra.gmra.mrb[22].mxu1 %vm448_vm6, %v2582_v40  ;;  %2287 = vmatprep.subr.bf16.mxu1 %v2400_v35  ;;  %v2036_v40 = vld [vmem:[%s2767_s12 + $0x40] sm:$0xff] }
 0x621   :  { %v2190_v53 = vpop.f32.mrb[7].mxu0  ;;  %2200 = vmatmul.mubr.msk.f32.vlgmr.msra.gmra.mrb[8].mxu0 %vm711_vm4, %v1477_v52  ;;  %2289 = vmatpush3.bf16.msra.mxu1 %v2288_v48  ;;  %v2306_v4 = vpack.c.bf16 %v2037_v61, %v2036_v40 }
 0x622   :  { %2290 = vmatprep.subr.bf16.mxu1 %v2400_v35  ;;  %2295 = vmatpush3.bf16.msra.mxu0 %v2294_v51 }
 0x623   :  { %2215 = vmatprep.mubr.msk.f32.mxu1 %vm2399_vm1, %v2398_v14  ;;  %2296 = vmatprep.subr.bf16.mxu0 %v2400_v35 }
 0x624   :  { %2226 = vmatprep.mubr.msk.f32.mxu0 %vm2399_vm1, %v2398_v14 }
 0x625   :  { %2292 = vmatpush3.bf16.msra.mxu1 %v2291_v54 }
 0x626   :  { %2299 = vmatprep.subr.bf16.mxu1 %v2400_v35  ;;  %2298 = vmatpush3.bf16.msra.mxu0 %v2297_v57 }
 0x627   :  { %2305 = vmatprep.subr.bf16.mxu0 %v2400_v35 }
 0x6f3   :  { %v1633_v1 = vpop.f32.mrb[22].mxu1 }
 0x6f4   :  { %v1563_v2 = vpop.f32.mrb[8].mxu0  ;;  %v2206_v3 = vpop.f32.mrb[23].mxu1  ;;  %2216 = vmatmul.mubr.msk.f32.vlgmr.msra.gmra.mrb[24].mxu1 %vm711_vm4, %v1633_v1 }
 0x6f5   :  { %v1564_v5 = vadd.f32 %v2020_v62, %v1563_v2  ;;  %2301 = vmatpush3.bf16.msra.mxu1 %v2300_v60  ;;  %v2201_v6 = vpop.f32.mrb[9].mxu0  ;;  %2237 = vmatprep.mubr.msk.f32.mxu1 %vm2399_vm1, %v2398_v14 }
 0x6f6   :  { %2302 = vmatprep.subr.bf16.mxu1 %v2400_v35 }
 0x6f7   :  { %2227 = vmatmul.mubr.msk.f32.vlgmr.msra.gmra.mrb[10].mxu0 %vm711_vm4, %v1564_v5 }
 0x6f8   :  { %2307 = vmatpush3.bf16.msra.mxu0 %v2306_v4  ;;  %2248 = vmatprep.mubr.msk.f32.mxu0 %vm2399_vm1, %v2398_v14  ;;  %v2028_v14 = vld [vmem:[%s2766_s11 + $0x2] ss:$0 sm:$0xff] }
 0x6f9   :  { %2304 = vmatpush3.bf16.msra.mxu1 %v2303_v7  ;;  %2308 = vmatprep.subr.bf16.mxu0 %v2400_v35 }
 0x6fc   :  { %2238 = vmatmul.mubr.msk.f32.vlgmr.msra.gmra.mrb[26].mxu1 %vm711_vm4, %v2547_v9  ;;  %2310 = vmatpush3.bf16.msra.mxu0 %v2309_v11 }
 0x7c7   :  { %v1719_v12 = vpop.f32.mrb[24].mxu1 }
 0x7c8   :  { %v1720_v13 = vadd.f32 %v2028_v14, %v1719_v12  ;;  %v2217_v35 = vpop.f32.mrb[25].mxu1 }
 0x7ca   :  { %v1801_v15 = vpop.f32.mrb[10].mxu0  ;;  %2249 = vmatmul.mubr.msk.f32.vlgmr.msra.gmra.mrb[12].mxu0 %vm711_vm4, %v1720_v13 }
 0x7cb   :  { %v2228_v9 = vpop.f32.mrb[11].mxu0 }
 0x7cf   :  { %v1874_v16 = vpop.f32.mrb[26].mxu1 }
 0x7d0   :  { %v1875_v17 = vadd.f32 %v1874_v16, %v1801_v15  ;;  %v2239_v18 = vpop.f32.mrb[27].mxu1 }
 0x89d   :  { %v1952_v19 = vpop.f32.mrb[12].mxu0 }
 0x89e   :  { %v1956_v21 = vadd.f32 %v1952_v19, %v1875_v17  ;;  %v2250_v22 = vpop.f32.mrb[13].mxu0 }
 0x8a0   :  { %v1959_v23 = vadd.f32 %v1958_v20, %v1956_v21 }
 0x8a2   :  { %1961 = vst.msk [vmem:[%s2768_s13] sm:$0xff] %vm1960_vm15, %v1959_v23 }
 0x8a3   :  { %1966 = vsyncpa [#allocation3], 1 }

</bundles_post_ra>
